<compile_context>
chip_gen: v6e
topology: v6e:2x2x1
jax: 0.10.0
libtpu: 0.0.40
codegen_flags: <defaults>
</compile_context>

<pallas_src>
import functools

import jax
import jax.numpy as jnp
from jax.experimental import pallas as pl
from jax.experimental.pallas import tpu as pltpu


_SUBLANE = 8  # batch tiles are multiples of this


def _round_up(n, m):
    return ((n + m - 1) // m) * m


def _fused_mlp_kernel(*refs, num_layers):
    """Fused MLP body.

    refs = (x_ref, w0_ref, b0_ref, w1_ref, b1_ref, ..., o_ref)
    Hidden layers: tanh(x @ W + b); final layer: x @ W + b (init_bias already
    folded into the last bias).  All intermediates stay in vregs/VMEM.
    """
    x_ref = refs[0]
    o_ref = refs[-1]
    wb_refs = refs[1:-1]

    x = x_ref[...].astype(jnp.float32)
    for li in range(num_layers):
        w = wb_refs[2 * li][...]
        b = wb_refs[2 * li + 1][...]
        y = jnp.dot(x.astype(w.dtype), w, preferred_element_type=jnp.float32) + b
        if li < num_layers - 1:
            x = jnp.tanh(y)          # EUP transcendental, f32 (v5e-safe)
        else:
            x = y
    o_ref[...] = x.astype(o_ref.dtype)


class MLPPallas:
    """JAX/Pallas port of bandit/core.py::MLP forward.

    Semantics: hidden layers use tanh, final layer has no activation
    (output_activation=None in the spec path), then `+ init_bias`; optional
    squeeze.  Biases are initialized to zero (matching nn.init.zeros_).
    """

    def __init__(self, layers, output_squeeze=False, init_bias=0.0, key=None,
                 param_dtype=jnp.float32, max_batch_tile=1024,
                 min_rows_to_split=128):
        self.dims = list(layers)
        self.output_squeeze = output_squeeze
        self.init_bias = float(init_bias)
        self.max_batch_tile = max(_SUBLANE, int(max_batch_tile))
        self.min_rows_to_split = int(min_rows_to_split)

        if key is None:
            key = jax.random.PRNGKey(0)

        self.weights = []   # [in, out], stored in param_dtype (unpadded)
        self.biases = []    # [1, out], f32 (unpadded)
        for i, out_dim in enumerate(layers[1:]):
            in_dim = layers[i]
            key, wkey = jax.random.split(key)
            # deterministic init analogous to nn.Linear default (+/- 1/sqrt(in))
            bound = 1.0 / float(in_dim) ** 0.5
            w = jax.random.uniform(
                wkey, (in_dim, out_dim), jnp.float32, minval=-bound, maxval=bound
            )
            b = jnp.zeros((1, out_dim), jnp.float32)
            self.weights.append(w.astype(param_dtype))
            self.biases.append(b)

        # Fold init_bias into the last layer's bias (real columns only).
        self.biases[-1] = self.biases[-1] + jnp.float32(self.init_bias)

        self._jit_forward = jax.jit(self._forward)

    # ---------------------------------------------------------------- pallas
    def _pallas_forward(self, x2d):
        batch, d_in = x2d.shape
        num_layers = len(self.weights)
        d_out = self.dims[-1]

        kernel = functools.partial(_fused_mlp_kernel, num_layers=num_layers)

        wb_args = []
        for w, b in zip(self.weights, self.biases):
            wb_args.append(w)
            wb_args.append(b)

        # Advisory cost estimate (true, unpadded byte counts).
        flops = 2 * batch * sum(w.shape[0] * w.shape[1] for w in self.weights)
        trans = batch * sum(w.shape[1] for w in self.weights[:-1])
        bytes_accessed = (
            x2d.size * x2d.dtype.itemsize
            + sum(w.size * w.dtype.itemsize for w in self.weights)
            + sum(b.size * b.dtype.itemsize for b in self.biases)
            + batch * d_out * 4
        )
        cost = pl.CostEstimate(
            flops=int(flops),
            transcendentals=int(trans),
            bytes_accessed=int(bytes_accessed),
        )

        # Tiling policy: even tiles, multiple of 8, and force >=2 tiles for
        # medium batches so v7x megacore has work on both TensorCores.
        num_tiles = pl.cdiv(batch, self.max_batch_tile)
        if num_tiles == 1 and batch >= self.min_rows_to_split:
            num_tiles = 2
        if num_tiles > 1:
            tb = _round_up(pl.cdiv(batch, num_tiles), _SUBLANE)
            bp = num_tiles * tb
        else:
            tb = batch
            bp = batch

        if bp != batch:
            # Pad only the batch dim (zeros are numerically inert; padded rows
            # are sliced off below).  Cheap under jit.
            x2d = jnp.zeros((bp, d_in), x2d.dtype).at[:batch, :].set(x2d)

        out_shape = jax.ShapeDtypeStruct((bp, d_out), jnp.float32)

        if num_tiles == 1:
            # Tiny batch: no grid, whole arrays are single full-extent blocks.
            out = pl.pallas_call(
                kernel,
                out_shape=out_shape,
                cost_estimate=cost,
            )(x2d, *wb_args)
        else:
            # Batch-tiled grid, "parallel" (megacore on v7x; no-op on v5e/v6e).
            # Weight/bias BlockSpecs are grid-invariant -> DMA'd once,
            # VMEM-resident across all batch tiles.
            in_specs = [pl.BlockSpec((tb, d_in), lambda i: (i, 0))]
            for w, b in zip(self.weights, self.biases):
                in_specs.append(pl.BlockSpec(w.shape, lambda i: (0, 0)))
                in_specs.append(pl.BlockSpec(b.shape, lambda i: (0, 0)))
            out_specs = pl.BlockSpec((tb, d_out), lambda i: (i, 0))

            out = pl.pallas_call(
                kernel,
                out_shape=out_shape,
                grid=(num_tiles,),
                in_specs=in_specs,
                out_specs=out_specs,
                compiler_params=pltpu.CompilerParams(
                    dimension_semantics=("parallel",)
                ),
                cost_estimate=cost,
            )(x2d, *wb_args)

        if bp != batch:
            out = out[:batch]
        return out

    # --------------------------------------------------------------- forward
    def _forward(self, x):
        x = jnp.asarray(x, jnp.float32)
        lead_shape = x.shape[:-1]
        d_in = x.shape[-1]
        assert d_in == self.dims[0], (d_in, self.dims[0])

        x2d = x.reshape((-1, d_in))
        out = self._pallas_forward(x2d)
        out = out.reshape(lead_shape + (self.dims[-1],))
        if self.output_squeeze:
            out = jnp.squeeze(out)
        return out

    def __call__(self, x):
        return self._jit_forward(x)


# ------------------------------------------------------------------ reference
def _reference_mlp(mlp, x):
    """Pure-JAX reference using the same stored weights (cast to f32)."""
    x = jnp.asarray(x, jnp.float32)
    for w, b in zip(mlp.weights[:-1], mlp.biases[:-1]):
        x = jnp.tanh(x @ w.astype(jnp.float32) + b)
    x = x @ mlp.weights[-1].astype(jnp.float32) + mlp.biases[-1]  # init_bias folded in
    if mlp.output_squeeze:
        x = jnp.squeeze(x)
    return x


if __name__ == "__main__":
    key = jax.random.PRNGKey(0)
    key, xkey, x2key, pkey = jax.random.split(key, 4)

    layer_sizes = [32, 64, 64, 16]   # MLP(layers=[32, 64, 64, 16])
    mlp = MLPPallas(layer_sizes, output_squeeze=False, init_bias=0.5, key=pkey)

    # Small batch: exercises the no-grid fully-fused path (unpadded shapes).
    batch = 8
    x = jax.random.normal(xkey, (batch, layer_sizes[0]), jnp.float32)
    out = jax.block_until_ready(mlp(x))
    ref = _reference_mlp(mlp, x)
    assert out.shape == (batch, layer_sizes[-1]), out.shape
    assert jnp.allclose(out, ref, atol=1e-4, rtol=1e-4), "small-batch mismatch"

    # Larger ragged batch: exercises the batch-tiled "parallel" grid path
    # (2 tiles of 152 rows, only 4 padded rows).
    batch2 = 300
    x2 = jax.random.normal(x2key, (batch2, layer_sizes[0]), jnp.float32)
    out2 = jax.block_until_ready(mlp(x2))
    ref2 = _reference_mlp(mlp, x2)
    assert out2.shape == (batch2, layer_sizes[-1]), out2.shape
    assert jnp.allclose(out2, ref2, atol=1e-4, rtol=1e-4), "tiled-batch mismatch"

    # bf16-parameter variant (v6e/v7x traffic optimization); f32 accumulation.
    mlp_bf16 = MLPPallas(layer_sizes, output_squeeze=False, init_bias=0.5,
                         key=pkey, param_dtype=jnp.bfloat16)
    out3 = jax.block_until_ready(mlp_bf16(x2))
    ref3 = _reference_mlp(mlp_bf16, x2)
    assert out3.shape == (batch2, layer_sizes[-1]), out3.shape
    assert jnp.allclose(out3, ref3, atol=5e-2, rtol=5e-2), "bf16 mismatch"

    print("KERNEL_OK")
</pallas_src>

<mosaic_0001>
module attributes {stable_mosaic.version = 11 : i64} {
  func.func @_fused_mlp_kernel(%arg0: memref<8x32xf32, #tpu.memory_space<vmem>>, %arg1: memref<32x64xf32, #tpu.memory_space<vmem>>, %arg2: memref<1x64xf32, #tpu.memory_space<vmem>>, %arg3: memref<64x64xf32, #tpu.memory_space<vmem>>, %arg4: memref<1x64xf32, #tpu.memory_space<vmem>>, %arg5: memref<64x16xf32, #tpu.memory_space<vmem>>, %arg6: memref<1x16xf32, #tpu.memory_space<vmem>>, %arg7: memref<8x16xf32, #tpu.memory_space<vmem>>) attributes {dimension_semantics = [], scalar_prefetch = 0 : i64, scratch_operands = 0 : i64, tpu.core_type = #tpu.core_type<tc>} {
    %c0 = arith.constant 0 : index
    %c0_0 = arith.constant 0 : index
    %0 = vector.load %arg0[%c0, %c0_0] : memref<8x32xf32, #tpu.memory_space<vmem>>, vector<8x32xf32>
    %c0_1 = arith.constant 0 : index
    %c0_2 = arith.constant 0 : index
    %1 = vector.load %arg1[%c0_1, %c0_2] : memref<32x64xf32, #tpu.memory_space<vmem>>, vector<32x64xf32>
    %c0_3 = arith.constant 0 : index
    %c0_4 = arith.constant 0 : index
    %2 = vector.load %arg2[%c0_3, %c0_4] : memref<1x64xf32, #tpu.memory_space<vmem>>, vector<1x64xf32>
    %cst = arith.constant dense<0.000000e+00> : vector<8x64xf32>
    %3 = tpu.matmul %0, %1, %cst {dimension_numbers = #tpu.dot_dimension_numbers<[1], [0], [0], [1], [0, 0, 1, 1], [], []>} : vector<8x32xf32>, vector<32x64xf32>, vector<8x64xf32> -> vector<8x64xf32>
    %4 = vector.broadcast %2 : vector<1x64xf32> to vector<8x64xf32>
    %5 = arith.addf %3, %4 : vector<8x64xf32>
    %6 = math.tanh %5 : vector<8x64xf32>
    %c0_5 = arith.constant 0 : index
    %c0_6 = arith.constant 0 : index
    %7 = vector.load %arg3[%c0_5, %c0_6] : memref<64x64xf32, #tpu.memory_space<vmem>>, vector<64x64xf32>
    %c0_7 = arith.constant 0 : index
    %c0_8 = arith.constant 0 : index
    %8 = vector.load %arg4[%c0_7, %c0_8] : memref<1x64xf32, #tpu.memory_space<vmem>>, vector<1x64xf32>
    %cst_9 = arith.constant dense<0.000000e+00> : vector<8x64xf32>
    %9 = tpu.matmul %6, %7, %cst_9 {dimension_numbers = #tpu.dot_dimension_numbers<[1], [0], [0], [1], [0, 0, 1, 1], [], []>} : vector<8x64xf32>, vector<64x64xf32>, vector<8x64xf32> -> vector<8x64xf32>
    %10 = vector.broadcast %8 : vector<1x64xf32> to vector<8x64xf32>
    %11 = arith.addf %9, %10 : vector<8x64xf32>
    %12 = math.tanh %11 : vector<8x64xf32>
    %c0_10 = arith.constant 0 : index
    %c0_11 = arith.constant 0 : index
    %13 = vector.load %arg5[%c0_10, %c0_11] : memref<64x16xf32, #tpu.memory_space<vmem>>, vector<64x16xf32>
    %c0_12 = arith.constant 0 : index
    %c0_13 = arith.constant 0 : index
    %14 = vector.load %arg6[%c0_12, %c0_13] : memref<1x16xf32, #tpu.memory_space<vmem>>, vector<1x16xf32>
    %cst_14 = arith.constant dense<0.000000e+00> : vector<8x16xf32>
    %15 = tpu.matmul %12, %13, %cst_14 {dimension_numbers = #tpu.dot_dimension_numbers<[1], [0], [0], [1], [0, 0, 1, 1], [], []>} : vector<8x64xf32>, vector<64x16xf32>, vector<8x16xf32> -> vector<8x16xf32>
    %16 = vector.broadcast %14 : vector<1x16xf32> to vector<8x16xf32>
    %17 = arith.addf %15, %16 : vector<8x16xf32>
    %c0_15 = arith.constant 0 : index
    %c0_16 = arith.constant 0 : index
    %18 = vector.load %arg7[%c0_15, %c0_16] : memref<8x16xf32, #tpu.memory_space<vmem>>, vector<8x16xf32>
    tpu.vector_store %arg7[%c0_15, %c0_16], %17 {strides = array<i32>} : memref<8x16xf32, #tpu.memory_space<vmem>>, vector<8x16xf32>,
    return
  }
}

</mosaic_0001>

<bundles_post_ra>
// kernel: _forward.1
= control target key start
LH: loop header
LB: loop body
LE: loop exit
PB: predicated region body
PF: predicated region fallthrough
CT: control target
= control target key end

     0   :  { %12 = vsyncpa [#allocation3], 0  ;;  %s673_s0 = inlined_call_operand.hbm [shape: f32[8,32], index: 0, kind: input, shape index: {}]   ;;  %s674_s1 = inlined_call_operand.hbm [shape: f32[32,64], index: 1, kind: input, shape index: {}]   ;;  %s675_s2 = inlined_call_operand.vmem [shape: f32[1,64], index: 2, kind: input, shape index: {}, may-alias: {2,4}]   ;;  %s676_s3 = inlined_call_operand.hbm [shape: f32[64,64], index: 3, kind: input, shape index: {}]   ;;  %s677_s4 = inlined_call_operand.vmem [shape: f32[1,64], index: 4, kind: input, shape index: {}, may-alias: {2,4}]   ;;  %s678_s5 = inlined_call_operand.hbm [shape: f32[64,16], index: 5, kind: input, shape index: {}]   ;;  %s679_s6 = inlined_call_operand.vmem [shape: f32[1,16], index: 6, kind: input, shape index: {}]   ;;  %s680_s7 = inlined_call_operand.hbm [shape: f32[8,16], index: 7, kind: output, shape index: {}]  }
   0x1   :  { %13 = vsyncpa [#allocation6], 0 }
   0x2   :  { %14 = vsyncpa [#allocation9], 0 }
   0x3   :  { %15 = vsyncpa [#allocation4], 0  ;;  %s563_s24 = smov [#allocation5]  }
   0x4   :  { %s31_s25 = sshll.u32 %s563_s24, 4  ;;  %s32_s25 = int_to_ptr.vmem [resolvable:$true] %s31_s25 }
   0x5   :  { %s463_s26 = scalar_lea.vmem %s32_s25, 512  ;;  %p468_p1 = scmp.lt.s32.totalorder %s32_s25, %s32_s25 }
   0x6   :  { %p464_p0 = scmp.ne.s32.totalorder %s32_s25, %s463_s26  ;;  %p469_p2 = scmp.lt.s32.totalorder %s463_s26, %s463_s26 }
   0x8   :  { %p470_p3 = por %p469_p2, %p468_p1 }
   0xa   :  { %p471_p4 = pnand %p470_p3, %p464_p0 }
   0xc   :  { %474 = shalt.err (!%p471_p4)
}
   0xd   :  { %s564_s27 = smov 128   ;;  %s565_s28 = smov 8  }
   0xe   :  { %37 = dma.hbm_to_vmem [thread:$0]  %s674_s1, 512, %s32_s25, [#allocation6], %s564_s27, %s564_s27, %s565_s28  }
   0xf   :  { %s566_s8 = smov [#allocation2]   ;;  %s567_s10 = smov [#allocation7]  }
  0x10   :  { %s22_s9 = sshll.u32 %s566_s8, 4  ;;  %s45_s11 = sshll.u32 %s567_s10, 4  ;;  %s23_s9 = int_to_ptr.vmem [resolvable:$true] %s22_s9  ;;  %s46_s11 = int_to_ptr.vmem [resolvable:$true] %s45_s11 }
  0x11   :  { %s483_s12 = scalar_lea.vmem %s23_s9, 128  ;;  %p488_p6 = scmp.lt.s32.totalorder %s23_s9, %s23_s9 }
  0x12   :  { %p484_p5 = scmp.ne.s32.totalorder %s23_s9, %s483_s12  ;;  %p489_p7 = scmp.lt.s32.totalorder %s483_s12, %s483_s12 }
  0x14   :  { %p490_p8 = por %p489_p7, %p488_p6 }
  0x16   :  { %p491_p9 = pnand %p490_p8, %p484_p5 }
  0x18   :  { %494 = shalt.err (!%p491_p9)
}
  0x19   :  { %25 = dma.hbm_to_vmem [thread:$0]  %s673_s0, 128, %s23_s9, [#allocation3]  }
  0x1a   :  { %s503_s15 = scalar_lea.vmem %s46_s11, 1024  ;;  %p508_p11 = scmp.lt.s32.totalorder %s46_s11, %s46_s11 }
  0x1b   :  { %p504_p10 = scmp.ne.s32.totalorder %s46_s11, %s503_s15  ;;  %p509_p12 = scmp.lt.s32.totalorder %s503_s15, %s503_s15 }
  0x1d   :  { %p510_p13 = por %p509_p12, %p508_p11 }
  0x1f   :  { %p511_p0 = pnand %p510_p13, %p504_p10 }
  0x21   :  { %514 = shalt.err (!%p511_p0)
}
  0x22   :  { %51 = dma.hbm_to_vmem [thread:$0]  %s676_s3, 1024, %s46_s11, [#allocation6], %s564_s27, %s564_s27, %s565_s28  }
  0x23   :  { %s568_s17 = smov [#allocation8]  }
  0x24   :  { %s59_s18 = sshll.u32 %s568_s17, 4  ;;  %s60_s18 = int_to_ptr.vmem [resolvable:$true] %s59_s18 }
  0x25   :  { %s523_s19 = scalar_lea.vmem %s60_s18, 1024  ;;  %p528_p2 = scmp.lt.s32.totalorder %s60_s18, %s60_s18 }
  0x26   :  { %p524_p1 = scmp.ne.s32.totalorder %s60_s18, %s523_s19  ;;  %p529_p3 = scmp.lt.s32.totalorder %s523_s19, %s523_s19 }
  0x28   :  { %p530_p4 = por %p529_p3, %p528_p2 }
  0x2a   :  { %p531_p5 = pnand %p530_p4, %p524_p1 }
  0x2c   :  { %534 = shalt.err (!%p531_p5)
}
  0x2d   :  { %65 = dma.hbm_to_vmem [thread:$0]  %s678_s5, 1024, %s60_s18, [#allocation9], %s564_s27, %s564_s27, %s565_s28  }
  0x2e   :  { %555 = dma.done.wait [#allocation3], 128  }
  0x2f   :  { %556 = vsyncadd [#allocation3], 4294967168 }
  0x30   :  { %557 = dma.done.wait [#allocation6], 1536  }
  0x31   :  { %558 = vsyncadd [#allocation6], 4294965760 }
  0x32   :  { %559 = dma.done.wait [#allocation9], 1024  }
  0x33   :  { %560 = vsyncadd [#allocation9], 4294966272  ;;  %v569_v0 = vmov 0.0   ;;  %vm570_vm0 = vmmov 0   ;;  %v84_v1 = vld [vmem:[#allocation5 + $0x18] sm:$0xff]  ;;  %v83_v2 = vld [vmem:[#allocation5 + $0x10] sm:$0xff] }
  0x34   :  { %393 = vmatprep.subr.mxu0 %v569_v0  ;;  %401 = vmatprep.mubr.msk.f32.mxu0 %vm570_vm0, %v569_v0  ;;  %v82_v3 = vld [vmem:[#allocation5 + $0x8] sm:$0xff]  ;;  %v81_v4 = vld [vmem:[#allocation5] sm:$0xff]  ;;  %v80_v5 = vld [vmem:[#allocation2] sm:$0xff]  ;;  %vm92_vm1 = vcmask 261120   ;;  %vm182_vm2 = vcmask 523264   ;;  %s571_s24 = smov [#allocation10]  }
  0x35   :  { %404 = vmatprep.subr.mxu1 %v569_v0  ;;  %420 = vmatprep.mubr.msk.f32.mxu1 %vm570_vm0, %v569_v0  ;;  %v174_v6 = vld [vmem:[#allocation7 + $0x38] sm:$0xff]  ;;  %v173_v7 = vld [vmem:[#allocation7 + $0x30] sm:$0xff]  ;;  %v172_v8 = vld [vmem:[#allocation7 + $0x28] sm:$0xff]  ;;  %s353_s25 = sshll.u32 %s571_s24, 4  ;;  %vm345_vm3 = vcmask 130048   ;;  %s354_s25 = int_to_ptr.vmem [resolvable:$true] %s353_s25 }
  0x36   :  { %394 = vmatpush3.msra.mxu0 %v84_v1  ;;  %405 = vmatpush3.msra.mxu1 %v174_v6  ;;  %v171_v9 = vld [vmem:[#allocation7 + $0x20] sm:$0xff]  ;;  %v170_v10 = vld [vmem:[#allocation7 + $0x18] sm:$0xff]  ;;  %v169_v11 = vld [vmem:[#allocation7 + $0x10] sm:$0xff]  ;;  %p540_p7 = scmp.lt.s32.totalorder %s354_s25, %s354_s25 }
  0x37   :  { %395 = vmatprep.subr.mxu0 %v569_v0  ;;  %406 = vmatprep.subr.mxu1 %v569_v0  ;;  %v168_v12 = vld [vmem:[#allocation7 + $0x8] sm:$0xff]  ;;  %v167_v13 = vld [vmem:[#allocation7] sm:$0xff]  ;;  %v364_v14 = vld [vmem:[%s675_s2] ss:$0 sm:$0xff] }
  0x38   :  { %396 = vmatpush3.msra.mxu0 %v83_v2  ;;  %407 = vmatpush3.msra.mxu1 %v173_v7  ;;  %v264_v19 = vld [vmem:[#allocation8 + $0x38] sm:$0xff]  ;;  %v263_v20 = vld [vmem:[#allocation8 + $0x30] sm:$0xff]  ;;  %v262_v21 = vld [vmem:[#allocation8 + $0x28] sm:$0xff] }
  0x39   :  { %397 = vmatprep.subr.mxu0 %v569_v0  ;;  %408 = vmatprep.subr.mxu1 %v569_v0  ;;  %v261_v22 = vld [vmem:[#allocation8 + $0x20] sm:$0xff]  ;;  %v260_v23 = vld [vmem:[#allocation8 + $0x18] sm:$0xff]  ;;  %v259_v24 = vld [vmem:[#allocation8 + $0x10] sm:$0xff] }
  0x3a   :  { %398 = vmatpush3.msra.mxu0 %v82_v3  ;;  %409 = vmatpush3.msra.mxu1 %v172_v8  ;;  %v258_v25 = vld [vmem:[#allocation8 + $0x8] sm:$0xff]  ;;  %v257_v26 = vld [vmem:[#allocation8] sm:$0xff]  ;;  %v366_v27 = vld [vmem:[%s677_s4] ss:$0 sm:$0xff]  ;;  %s535_s4 = scalar_lea.vmem %s354_s25, 128 }
  0x3b   :  { %399 = vmatprep.subr.mxu0 %v569_v0  ;;  %410 = vmatprep.subr.mxu1 %v569_v0  ;;  %v368_v32 = vld [vmem:[%s679_s6] ss:$0 sm:$0xff]  ;;  %p536_p6 = scmp.ne.s32.totalorder %s354_s25, %s535_s4  ;;  %p541_p8 = scmp.lt.s32.totalorder %s535_s4, %s535_s4 }
  0x3c   :  { %400 = vmatpush3.msra.mxu0 %v81_v4  ;;  %411 = vmatpush3.msra.mxu1 %v171_v9 }
  0x3d   :  { %402 = vmatmul.mubr.msk.f32.vlgmr.msra.gmra.mxu0 %vm92_vm1, %v80_v5  ;;  %423 = vmatprep.subr.mxu0 %v569_v0  ;;  %p542_p9 = por %p541_p8, %p540_p7 }
  0x3e   :  { %439 = vmatprep.mubr.msk.f32.mxu0 %vm570_vm0, %v569_v0  ;;  %412 = vmatprep.subr.mxu1 %v569_v0 }
  0x3f   :  { %413 = vmatpush3.msra.mxu1 %v170_v10  ;;  %424 = vmatpush3.msra.mxu0 %v264_v19  ;;  %p543_p10 = pnand %p542_p9, %p536_p6 }
  0x40   :  { %414 = vmatprep.subr.mxu1 %v569_v0  ;;  %425 = vmatprep.subr.mxu0 %v569_v0 }
  0x41   :  { %415 = vmatpush3.msra.mxu1 %v169_v11  ;;  %426 = vmatpush3.msra.mxu0 %v263_v20 }
  0x42   :  { %416 = vmatprep.subr.mxu1 %v569_v0  ;;  %427 = vmatprep.subr.mxu0 %v569_v0 }
  0x43   :  { %417 = vmatpush3.msra.mxu1 %v168_v12  ;;  %428 = vmatpush3.msra.mxu0 %v262_v21 }
  0x44   :  { %418 = vmatprep.subr.mxu1 %v569_v0  ;;  %429 = vmatprep.subr.mxu0 %v569_v0 }
  0x45   :  { %419 = vmatpush3.msra.mxu1 %v167_v13  ;;  %430 = vmatpush3.msra.mxu0 %v261_v22 }
  0x46   :  { %431 = vmatprep.subr.mxu0 %v569_v0 }
  0x47   :  { %432 = vmatpush3.msra.mxu0 %v260_v23 }
  0x48   :  { %433 = vmatprep.subr.mxu0 %v569_v0 }
  0x49   :  { %434 = vmatpush3.msra.mxu0 %v259_v24 }
  0x4a   :  { %435 = vmatprep.subr.mxu0 %v569_v0 }
  0x4b   :  { %436 = vmatpush3.msra.mxu0 %v258_v25 }
  0x4c   :  { %437 = vmatprep.subr.mxu0 %v569_v0 }
  0x4d   :  { %438 = vmatpush3.msra.mxu0 %v257_v26 }
  0xfd   :  { %v162_v15 = vpop.f32.mrf.mxu0 }
  0xfe   :  { %v163_v16 = vadd.f32 %v364_v14, %v162_v15 }
  0xff   :  { %v403_v17 = vpop.f32.mrf.mxu0 }
 0x100   :  { %451 = vtanh.f32 %v163_v16 }
 0x10d   :  { %v452_v18 = vpop.eup %451 }
 0x10e   :  { %421 = vmatmul.mubr.msk.f32.vlgmr.msra.gmra.mxu1 %vm182_vm2, %v452_v18 }
 0x1ce   :  { %v252_v28 = vpop.f32.mrf.mxu1 }
 0x1cf   :  { %v253_v29 = vadd.f32 %v366_v27, %v252_v28 }
 0x1d0   :  { %v422_v30 = vpop.f32.mrf.mxu1 }
 0x1d1   :  { %453 = vtanh.f32 %v253_v29 }
 0x1de   :  { %v454_v31 = vpop.eup %453 }
 0x1df   :  { %440 = vmatmul.mubr.msk.f32.vlgmr.msra.gmra.mxu0 %vm182_vm2, %v454_v31 }
 0x29f   :  { %v341_v33 = vpop.f32.mrf.mxu0 }
 0x2a0   :  { %v342_v34 = vadd.f32 %v368_v32, %v341_v33 }
 0x2a1   :  { %v441_v35 = vpop.f32.mrf.mxu0 }
 0x2a2   :  { %346 = vst.msk [vmem:[#allocation10] sm:$0xff] %vm345_vm3, %v342_v34 }
 0x2a3   :  { %546 = shalt.err (!%p543_p10)
}
 0x2a4   :  { %356 = dma.vmem_to_hbm [thread:$0]  %s354_s25, 128, %s680_s7, [#allocation4]  }
 0x2a5   :  { %561 = dma.done.wait [#allocation4], 128  }
 0x2a6   :  { %562 = vsyncadd [#allocation4], 4294967168 }
 0x2a7   :  { %360 = vsyncpa [#allocation3], 1 }
 0x2a8   :  { %361 = vsyncpa [#allocation6], 1 }
 0x2a9   :  { %362 = vsyncpa [#allocation9], 1 }
 0x2aa   :  { %363 = vsyncpa [#allocation4], 1 }

</bundles_post_ra>
